<compile_context>
chip_gen: v7x
topology: tpu7x:2x2x1
jax: 0.10.0
libtpu: 0.0.40
codegen_flags: <defaults>
</compile_context>

<pallas_src>
from typing import NamedTuple

import jax
import jax.numpy as jnp
from jax.experimental import pallas as pl
from jax.experimental.pallas import tpu as pltpu


def _round_up(x, m):
    return (x + m - 1) // m * m


class MHConv1DParams(NamedTuple):
    wp: jax.Array      # (n_groups, K_max*GD, GD) packed per-group tap weights
    bp: jax.Array      # (n_groups, 1, GD) float32 bias
    em_size: int
    num_heads: int
    head_dim: int
    group_heads: int
    group_dim: int
    n_groups: int
    k_max: int
    p_max: int


def _pick_group(num_heads, head_dim):
    # Smallest divisor g of H with g*D a multiple of 128 (lane-dense blocks).
    # Fallback: fuse all heads (group width == em_size, a legal full-dim block).
    for g in range(1, num_heads + 1):
        if num_heads % g == 0 and (g * head_dim) % 128 == 0:
            return g
    return num_heads


def pack_mh_conv1d_params(weights, biases, kernel_size_group, stride_group,
                          padding_group, *, compute_dtype=jnp.bfloat16):
    """Pack per-head Conv1d params into per-group im2col weights (do this once)."""
    H = len(kernel_size_group)
    D = weights[0].shape[0]
    E = H * D
    for w, b, k, s, p in zip(weights, biases, kernel_size_group, stride_group,
                             padding_group):
        assert w.shape == (D, D, k) and b.shape == (D,)
        assert s == 1, "kernel assumes stride 1"
        assert 2 * p == k - 1, "kernel assumes 'same' convs: padding == (k-1)//2"
        # TODO(synk): general stride/padding needs per-head output lengths, which
        # the PyTorch module itself cannot torch.stack anyway.

    K_max = max(kernel_size_group)
    P_max = (K_max - 1) // 2
    G = _pick_group(H, D)
    GD = G * D
    n_groups = H // G

    # rhs[g, j*GD + hh*D + i, hh*D + o] = torch_w_h[o, i, j - (P_max - p_h)]
    wp = jnp.zeros((n_groups, K_max * GD, GD), jnp.float32)
    for h, (w, k, p) in enumerate(zip(weights, kernel_size_group, padding_group)):
        g, hh = divmod(h, G)
        off = P_max - p
        wk = jnp.transpose(w, (2, 1, 0)).astype(jnp.float32)      # (k, D_in, D_out)
        for j in range(k):
            r0 = (off + j) * GD + hh * D
            wp = wp.at[g, r0:r0 + D, hh * D:(hh + 1) * D].set(wk[j])
    wp = wp.astype(compute_dtype)

    bp = jnp.stack([
        jnp.concatenate([biases[g * G + hh].reshape(-1) for hh in range(G)])
        for g in range(n_groups)]).reshape(n_groups, 1, GD).astype(jnp.float32)

    return MHConv1DParams(wp, bp, E, H, D, G, GD, n_groups, K_max, P_max)


def _make_kernel(k_max, p_max, seq_len, tile_n, tile_h, mask_tail):
    def kernel(xm_ref, xp_ref, xn_ref, w_ref, b_ref, o_ref, im_ref):
        # xm_ref: (1, tile_n, GD)  current sequence tile (may be partial at the end)
        # xp_ref: (1, tile_h, GD)  previous tile's tail (left halo, clamped at t=0)
        # xn_ref: (1, tile_h, GD)  next tile's head (right halo, clamped at last t)
        # w_ref : (1, K_max*GD, GD) packed per-group im2col weights (compute dtype)
        # b_ref : (1, 1, GD) float32 per-group bias
        # o_ref : (1, tile_n, GD)  output tile
        # im_ref: (tile_n, K_max*GD) im2col scratch (compute dtype)
        gd = o_ref.shape[2]
        cdt = im_ref.dtype
        t = pl.program_id(2)
        row0 = t * tile_n

        if p_max > 0:
            halo_iota = jax.lax.broadcasted_iota(jnp.int32, (tile_h, 1), 0)
            if mask_tail:
                row_abs = row0 + jax.lax.broadcasted_iota(jnp.int32, (tile_n, 1), 0)

        # Build the im2col LHS directly from the (prev, main, next) windows:
        # column block j holds input rows shifted by (j - p_max), zero outside [0, N).
        for j in range(k_max):
            s = j - p_max
            c0, c1 = j * gd, (j + 1) * gd
            if s < 0:
                pz = -s
                head = xp_ref[0, tile_h - pz:tile_h, :]
                head = jnp.where(row0 + s + halo_iota[0:pz] >= 0, head, 0)
                im_ref[0:pz, c0:c1] = head.astype(cdt)
                if tile_n - pz > 0:
                    im_ref[pz:tile_n, c0:c1] = xm_ref[0, 0:tile_n - pz, :].astype(cdt)
            elif s == 0:
                im_ref[:, c0:c1] = xm_ref[0].astype(cdt)
            else:
                if tile_n - s > 0:
                    body = xm_ref[0, s:tile_n, :]
                    if mask_tail:
                        body = jnp.where(row_abs[s:] < seq_len, body, 0)
                    im_ref[0:tile_n - s, c0:c1] = body.astype(cdt)
                tail = xn_ref[0, 0:s, :]
                tail = jnp.where(row0 + tile_n + halo_iota[0:s] < seq_len, tail, 0)
                im_ref[tile_n - s:tile_n, c0:c1] = tail.astype(cdt)

        # One deep MXU matmul; bias fused into the single epilogue add.
        acc = jnp.dot(im_ref[...], w_ref[0], preferred_element_type=jnp.float32)
        o_ref[0] = (acc + b_ref[0]).astype(o_ref.dtype)

    return kernel


def multi_head_conv1d(x, params: MHConv1DParams, *, out_dtype=None,
                      compute_dtype=jnp.bfloat16, max_tile_rows=2048):
    """x: (B, N, em_size) -> (B, N, em_size). Matches MultiHeadConv1D.forward."""
    B, N, E = x.shape
    assert E == params.em_size
    GD, n_groups = params.group_dim, params.n_groups
    K_max, P_max = params.k_max, params.p_max
    out_dtype = x.dtype if out_dtype is None else out_dtype
    # TODO(synk): out_dtype=bfloat16 halves output HBM traffic if consumers allow it.

    # --- tile sizing: big lane-dense blocks (~1 MiB main block), VMEM budgeted ----
    tile_h = _round_up(max(P_max, 1), 8)
    x_bytes = jnp.dtype(x.dtype).itemsize
    rows = (1 << 20) // (GD * x_bytes)
    rows = min(rows, max_tile_rows, _round_up(N, tile_h))
    tile_n = max(tile_h, rows // tile_h * tile_h)         # multiple of tile_h (and 8)
    n_tiles = pl.cdiv(N, tile_n)
    hs = tile_n // tile_h                                  # halo-spec block-index step
    n_halo_blocks = pl.cdiv(N, tile_h)
    mask_tail = (N % tile_n) != 0

    kernel = _make_kernel(K_max, P_max, N, tile_n, tile_h, mask_tail)

    cd_bytes = jnp.dtype(compute_dtype).itemsize
    o_bytes = jnp.dtype(out_dtype).itemsize
    vmem_est = (2 * tile_n * GD * x_bytes          # main input (double-buffered)
                + 4 * tile_h * GD * x_bytes        # prev + next halos
                + 2 * K_max * GD * GD * cd_bytes   # packed weights
                + 2 * tile_n * GD * o_bytes        # output
                + tile_n * K_max * GD * cd_bytes   # im2col scratch
                + 4 * GD * 4)                      # bias
    vmem_limit = int(min(48 << 20, max(32 << 20, 2 * vmem_est)))

    return pl.pallas_call(
        kernel,
        out_shape=jax.ShapeDtypeStruct((B, N, E), out_dtype),
        grid_spec=pltpu.PrefetchScalarGridSpec(
            num_scalar_prefetch=0,
            grid=(B, n_groups, n_tiles),           # tiles fastest: weight stays put per group
            in_specs=[
                pl.BlockSpec((1, tile_n, GD), lambda b, g, t: (b, t, g)),
                pl.BlockSpec((1, tile_h, GD),
                             lambda b, g, t: (b, jnp.maximum(t * hs - 1, 0), g)),
                pl.BlockSpec((1, tile_h, GD),
                             lambda b, g, t: (b, jnp.minimum((t + 1) * hs,
                                                             n_halo_blocks - 1), g)),
                pl.BlockSpec((1, K_max * GD, GD), lambda b, g, t: (g, 0, 0)),
                pl.BlockSpec((1, 1, GD), lambda b, g, t: (g, 0, 0)),
            ],
            out_specs=pl.BlockSpec((1, tile_n, GD), lambda b, g, t: (b, t, g)),
            scratch_shapes=[pltpu.VMEM((tile_n, K_max * GD), compute_dtype)],
        ),
        compiler_params=pltpu.CompilerParams(
            dimension_semantics=("parallel", "parallel", "parallel"),
            vmem_limit_bytes=vmem_limit),
    )(x, x, x, params.wp, params.bp)


if __name__ == "__main__":
    key = jax.random.PRNGKey(0)

    # Small config consistent with the module: em_size divisible by num_heads.
    em_size = 32
    kernel_size_group = (1, 3, 5, 7)
    stride_group = (1, 1, 1, 1)
    padding_group = (0, 1, 2, 3)
    H = len(kernel_size_group)
    D = em_size // H
    B, N = 2, 19     # N chosen so partial tiles / halos are exercised

    keys = jax.random.split(key, 2 * H + 1)
    x = jax.random.normal(keys[0], (B, N, em_size), jnp.float32)

    # Deterministic per-head Conv1d params (PyTorch shapes: W (out, in, k), b (out,)).
    weights, biases = [], []
    for h, k in enumerate(kernel_size_group):
        bound = 1.0 / ((D * k) ** 0.5)
        weights.append(jax.random.uniform(keys[1 + 2 * h], (D, D, k),
                                          jnp.float32, -bound, bound))
        biases.append(jax.random.uniform(keys[2 + 2 * h], (D,),
                                         jnp.float32, -bound, bound))

    params = pack_mh_conv1d_params(weights, biases, kernel_size_group,
                                   stride_group, padding_group)
    out = jax.block_until_ready(multi_head_conv1d(x, params))
    # Force multiple sequence tiles to exercise halo fetch, clamping and masking.
    out_tiled = jax.block_until_ready(multi_head_conv1d(x, params, max_tile_rows=8))

    # Pure-JAX reference of the PyTorch forward (projection is dead code there),
    # using the same bf16 input/weight rounding + fp32 accumulation as the kernel.
    xc = x.astype(jnp.bfloat16).astype(jnp.float32)
    ref_heads = []
    for h, (k, p) in enumerate(zip(kernel_size_group, padding_group)):
        xh = xc[:, :, h * D:(h + 1) * D]                         # (B, N, D)
        xph = jnp.pad(xh, ((0, 0), (p, p), (0, 0)))
        wc = weights[h].astype(jnp.bfloat16).astype(jnp.float32)
        o = jnp.broadcast_to(biases[h][None, None, :], (B, N, D)).astype(jnp.float32)
        for j in range(k):
            o = o + jnp.einsum('bni,oi->bno', xph[:, j:j + N, :], wc[:, :, j],
                               precision=jax.lax.Precision.HIGHEST)
        ref_heads.append(o)
    ref = jnp.concatenate(ref_heads, axis=-1)                    # 'h b n d -> b n (h d)'

    assert out.shape == (B, N, em_size)
    assert jnp.allclose(out, ref, atol=2e-3, rtol=2e-3), "kernel/reference mismatch"
    assert jnp.allclose(out_tiled, ref, atol=2e-3, rtol=2e-3), "tiled kernel mismatch"
    print("KERNEL_OK")
</pallas_src>

<mosaic_0001>
module attributes {stable_mosaic.version = 11 : i64} {
  func.func @kernel(%arg0: i32, %arg1: i32, %arg2: i32, %arg3: memref<1x24x32xf32, #tpu.memory_space<vmem>>, %arg4: memref<1x8x32xf32, #tpu.memory_space<vmem>>, %arg5: memref<1x8x32xf32, #tpu.memory_space<vmem>>, %arg6: memref<1x224x32xbf16, #tpu.memory_space<vmem>>, %arg7: memref<1x1x32xf32, #tpu.memory_space<vmem>>, %arg8: memref<1x24x32xf32, #tpu.memory_space<vmem>>, %arg9: memref<24x224xbf16, #tpu.memory_space<vmem>>) attributes {dimension_semantics = [#tpu.dimension_semantics<parallel>, #tpu.dimension_semantics<parallel>, #tpu.dimension_semantics<parallel>], iteration_bounds = array<i64: 2, 1, 1>, scalar_prefetch = 0 : i64, scratch_operands = 1 : i64, tpu.core_type = #tpu.core_type<tc>, window_params = [{transform_indices = @transform_0, window_bounds = array<i64: 1, 24, 32>}, {transform_indices = @transform_1, window_bounds = array<i64: 1, 8, 32>}, {transform_indices = @transform_2, window_bounds = array<i64: 1, 8, 32>}, {transform_indices = @transform_3, window_bounds = array<i64: 1, 224, 32>}, {transform_indices = @transform_4, window_bounds = array<i64: 1, 1, 32>}, {transform_indices = @transform_5, window_bounds = array<i64: 1, 24, 32>}]} {
    %c24_i32 = arith.constant 24 : i32
    %0 = arith.muli %arg2, %c24_i32 : i32
    %1 = tpu.iota {dimensions = array<i32: 0>} : vector<8x1xi32>
    %2 = tpu.iota {dimensions = array<i32: 0>} : vector<24x1xi32>
    %3 = vector.broadcast %0 : i32 to vector<24x1xi32>
    %4 = arith.addi %3, %2 : vector<24x1xi32>
    %c0 = arith.constant 0 : index
    %c5 = arith.constant 5 : index
    %c0_0 = arith.constant 0 : index
    %5 = vector.load %arg4[%c0, %c5, %c0_0] : memref<1x8x32xf32, #tpu.memory_space<vmem>>, vector<1x3x32xf32>
    %6 = vector.shape_cast %5 : vector<1x3x32xf32> to vector<3x32xf32>
    %c-3_i32 = arith.constant -3 : i32
    %7 = arith.addi %0, %c-3_i32 : i32
    %8 = vector.extract_strided_slice %1 {offsets = [0, 0], sizes = [3, 1], strides = [1, 1]} : vector<8x1xi32> to vector<3x1xi32>
    %9 = vector.broadcast %7 : i32 to vector<3x1xi32>
    %10 = arith.addi %9, %8 : vector<3x1xi32>
    %c0_i32 = arith.constant 0 : i32
    %11 = vector.broadcast %c0_i32 : i32 to vector<3x1xi32>
    %12 = arith.cmpi sge, %10, %11 : vector<3x1xi32>
    %c0_i32_1 = arith.constant 0 : i32
    %13 = arith.sitofp %c0_i32_1 : i32 to f32
    %14 = vector.shape_cast %12 : vector<3x1xi1> to vector<3x1xi1>
    %15 = vector.broadcast %14 : vector<3x1xi1> to vector<3x32xi1>
    %16 = vector.broadcast %13 : f32 to vector<3x32xf32>
    %17 = arith.select %15, %6, %16 : vector<3x32xi1>, vector<3x32xf32>
    %18 = arith.truncf %17 : vector<3x32xf32> to vector<3x32xbf16>
    %c0_2 = arith.constant 0 : index
    %c0_3 = arith.constant 0 : index
    %19 = vector.load %arg9[%c0_2, %c0_3] : memref<24x224xbf16, #tpu.memory_space<vmem>>, vector<3x32xbf16>
    tpu.vector_store %arg9[%c0_2, %c0_3], %18 {strides = array<i32>} : memref<24x224xbf16, #tpu.memory_space<vmem>>, vector<3x32xbf16>,
    %c0_4 = arith.constant 0 : index
    %c0_5 = arith.constant 0 : index
    %c0_6 = arith.constant 0 : index
    %20 = vector.load %arg3[%c0_4, %c0_5, %c0_6] : memref<1x24x32xf32, #tpu.memory_space<vmem>>, vector<1x21x32xf32>
    %21 = vector.shape_cast %20 : vector<1x21x32xf32> to vector<21x32xf32>
    %22 = arith.truncf %21 : vector<21x32xf32> to vector<21x32xbf16>
    %c3 = arith.constant 3 : index
    %c0_7 = arith.constant 0 : index
    %23 = vector.load %arg9[%c3, %c0_7] : memref<24x224xbf16, #tpu.memory_space<vmem>>, vector<21x32xbf16>
    tpu.vector_store %arg9[%c3, %c0_7], %22 {strides = array<i32>} : memref<24x224xbf16, #tpu.memory_space<vmem>>, vector<21x32xbf16>,
    %c0_8 = arith.constant 0 : index
    %c6 = arith.constant 6 : index
    %c0_9 = arith.constant 0 : index
    %24 = vector.load %arg4[%c0_8, %c6, %c0_9] : memref<1x8x32xf32, #tpu.memory_space<vmem>>, vector<1x2x32xf32>
    %25 = vector.shape_cast %24 : vector<1x2x32xf32> to vector<2x32xf32>
    %c-2_i32 = arith.constant -2 : i32
    %26 = arith.addi %0, %c-2_i32 : i32
    %27 = vector.extract_strided_slice %1 {offsets = [0, 0], sizes = [2, 1], strides = [1, 1]} : vector<8x1xi32> to vector<2x1xi32>
    %28 = vector.broadcast %26 : i32 to vector<2x1xi32>
    %29 = arith.addi %28, %27 : vector<2x1xi32>
    %c0_i32_10 = arith.constant 0 : i32
    %30 = vector.broadcast %c0_i32_10 : i32 to vector<2x1xi32>
    %31 = arith.cmpi sge, %29, %30 : vector<2x1xi32>
    %c0_i32_11 = arith.constant 0 : i32
    %32 = arith.sitofp %c0_i32_11 : i32 to f32
    %33 = vector.shape_cast %31 : vector<2x1xi1> to vector<2x1xi1>
    %34 = vector.broadcast %33 : vector<2x1xi1> to vector<2x32xi1>
    %35 = vector.broadcast %32 : f32 to vector<2x32xf32>
    %36 = arith.select %34, %25, %35 : vector<2x32xi1>, vector<2x32xf32>
    %37 = arith.truncf %36 : vector<2x32xf32> to vector<2x32xbf16>
    %c0_12 = arith.constant 0 : index
    %c32 = arith.constant 32 : index
    %38 = vector.load %arg9[%c0_12, %c32] : memref<24x224xbf16, #tpu.memory_space<vmem>>, vector<2x32xbf16>
    tpu.vector_store %arg9[%c0_12, %c32], %37 {strides = array<i32>} : memref<24x224xbf16, #tpu.memory_space<vmem>>, vector<2x32xbf16>,
    %c0_13 = arith.constant 0 : index
    %c0_14 = arith.constant 0 : index
    %c0_15 = arith.constant 0 : index
    %39 = vector.load %arg3[%c0_13, %c0_14, %c0_15] : memref<1x24x32xf32, #tpu.memory_space<vmem>>, vector<1x22x32xf32>
    %40 = vector.shape_cast %39 : vector<1x22x32xf32> to vector<22x32xf32>
    %41 = arith.truncf %40 : vector<22x32xf32> to vector<22x32xbf16>
    %c2 = arith.constant 2 : index
    %c32_16 = arith.constant 32 : index
    %42 = vector.load %arg9[%c2, %c32_16] : memref<24x224xbf16, #tpu.memory_space<vmem>>, vector<22x32xbf16>
    tpu.vector_store %arg9[%c2, %c32_16], %41 {strides = array<i32>} : memref<24x224xbf16, #tpu.memory_space<vmem>>, vector<22x32xbf16>,
    %c0_17 = arith.constant 0 : index
    %c7 = arith.constant 7 : index
    %c0_18 = arith.constant 0 : index
    %43 = vector.load %arg4[%c0_17, %c7, %c0_18] : memref<1x8x32xf32, #tpu.memory_space<vmem>>, vector<1x1x32xf32>
    %44 = vector.shape_cast %43 : vector<1x1x32xf32> to vector<1x32xf32>
    %c-1_i32 = arith.constant -1 : i32
    %45 = arith.addi %0, %c-1_i32 : i32
    %46 = vector.extract_strided_slice %1 {offsets = [0, 0], sizes = [1, 1], strides = [1, 1]} : vector<8x1xi32> to vector<1x1xi32>
    %47 = vector.broadcast %45 : i32 to vector<1x1xi32>
    %48 = arith.addi %47, %46 : vector<1x1xi32>
    %c0_i32_19 = arith.constant 0 : i32
    %49 = vector.broadcast %c0_i32_19 : i32 to vector<1x1xi32>
    %50 = arith.cmpi sge, %48, %49 : vector<1x1xi32>
    %c0_i32_20 = arith.constant 0 : i32
    %51 = arith.sitofp %c0_i32_20 : i32 to f32
    %52 = vector.shape_cast %50 : vector<1x1xi1> to vector<1x1xi1>
    %53 = vector.broadcast %52 : vector<1x1xi1> to vector<1x32xi1>
    %54 = vector.broadcast %51 : f32 to vector<1x32xf32>
    %55 = arith.select %53, %44, %54 : vector<1x32xi1>, vector<1x32xf32>
    %56 = arith.truncf %55 : vector<1x32xf32> to vector<1x32xbf16>
    %c0_21 = arith.constant 0 : index
    %c64 = arith.constant 64 : index
    %57 = vector.load %arg9[%c0_21, %c64] : memref<24x224xbf16, #tpu.memory_space<vmem>>, vector<1x32xbf16>
    tpu.vector_store %arg9[%c0_21, %c64], %56 {strides = array<i32>} : memref<24x224xbf16, #tpu.memory_space<vmem>>, vector<1x32xbf16>,
    %c0_22 = arith.constant 0 : index
    %c0_23 = arith.constant 0 : index
    %c0_24 = arith.constant 0 : index
    %58 = vector.load %arg3[%c0_22, %c0_23, %c0_24] : memref<1x24x32xf32, #tpu.memory_space<vmem>>, vector<1x23x32xf32>
    %59 = vector.shape_cast %58 : vector<1x23x32xf32> to vector<23x32xf32>
    %60 = arith.truncf %59 : vector<23x32xf32> to vector<23x32xbf16>
    %c1 = arith.constant 1 : index
    %c64_25 = arith.constant 64 : index
    %61 = vector.load %arg9[%c1, %c64_25] : memref<24x224xbf16, #tpu.memory_space<vmem>>, vector<23x32xbf16>
    tpu.vector_store %arg9[%c1, %c64_25], %60 {strides = array<i32>} : memref<24x224xbf16, #tpu.memory_space<vmem>>, vector<23x32xbf16>,
    %c0_26 = arith.constant 0 : index
    %c0_27 = arith.constant 0 : index
    %c0_28 = arith.constant 0 : index
    %62 = vector.load %arg3[%c0_26, %c0_27, %c0_28] : memref<1x24x32xf32, #tpu.memory_space<vmem>>, vector<1x24x32xf32>
    %63 = vector.shape_cast %62 : vector<1x24x32xf32> to vector<24x32xf32>
    %64 = arith.truncf %63 : vector<24x32xf32> to vector<24x32xbf16>
    %c0_29 = arith.constant 0 : index
    %c96 = arith.constant 96 : index
    %65 = vector.load %arg9[%c0_29, %c96] : memref<24x224xbf16, #tpu.memory_space<vmem>>, vector<24x32xbf16>
    tpu.vector_store %arg9[%c0_29, %c96], %64 {strides = array<i32>} : memref<24x224xbf16, #tpu.memory_space<vmem>>, vector<24x32xbf16>,
    %c0_30 = arith.constant 0 : index
    %c1_31 = arith.constant 1 : index
    %c0_32 = arith.constant 0 : index
    %66 = vector.load %arg3[%c0_30, %c1_31, %c0_32] : memref<1x24x32xf32, #tpu.memory_space<vmem>>, vector<1x23x32xf32>
    %67 = vector.shape_cast %66 : vector<1x23x32xf32> to vector<23x32xf32>
    %68 = vector.extract_strided_slice %4 {offsets = [1, 0], sizes = [23, 1], strides = [1, 1]} : vector<24x1xi32> to vector<23x1xi32>
    %c19_i32 = arith.constant 19 : i32
    %69 = vector.broadcast %c19_i32 : i32 to vector<23x1xi32>
    %70 = arith.cmpi slt, %68, %69 : vector<23x1xi32>
    %c0_i32_33 = arith.constant 0 : i32
    %71 = arith.sitofp %c0_i32_33 : i32 to f32
    %72 = vector.shape_cast %70 : vector<23x1xi1> to vector<23x1xi1>
    %73 = vector.broadcast %72 : vector<23x1xi1> to vector<23x32xi1>
    %74 = vector.broadcast %71 : f32 to vector<23x32xf32>
    %75 = arith.select %73, %67, %74 : vector<23x32xi1>, vector<23x32xf32>
    %76 = arith.truncf %75 : vector<23x32xf32> to vector<23x32xbf16>
    %c0_34 = arith.constant 0 : index
    %c128 = arith.constant 128 : index
    %77 = vector.load %arg9[%c0_34, %c128] : memref<24x224xbf16, #tpu.memory_space<vmem>>, vector<23x32xbf16>
    tpu.vector_store %arg9[%c0_34, %c128], %76 {strides = array<i32>} : memref<24x224xbf16, #tpu.memory_space<vmem>>, vector<23x32xbf16>,
    %c0_35 = arith.constant 0 : index
    %c0_36 = arith.constant 0 : index
    %c0_37 = arith.constant 0 : index
    %78 = vector.load %arg5[%c0_35, %c0_36, %c0_37] : memref<1x8x32xf32, #tpu.memory_space<vmem>>, vector<1x1x32xf32>
    %79 = vector.shape_cast %78 : vector<1x1x32xf32> to vector<1x32xf32>
    %c24_i32_38 = arith.constant 24 : i32
    %80 = arith.addi %0, %c24_i32_38 : i32
    %81 = vector.extract_strided_slice %1 {offsets = [0, 0], sizes = [1, 1], strides = [1, 1]} : vector<8x1xi32> to vector<1x1xi32>
    %82 = vector.broadcast %80 : i32 to vector<1x1xi32>
    %83 = arith.addi %82, %81 : vector<1x1xi32>
    %c19_i32_39 = arith.constant 19 : i32
    %84 = vector.broadcast %c19_i32_39 : i32 to vector<1x1xi32>
    %85 = arith.cmpi slt, %83, %84 : vector<1x1xi32>
    %c0_i32_40 = arith.constant 0 : i32
    %86 = arith.sitofp %c0_i32_40 : i32 to f32
    %87 = vector.shape_cast %85 : vector<1x1xi1> to vector<1x1xi1>
    %88 = vector.broadcast %87 : vector<1x1xi1> to vector<1x32xi1>
    %89 = vector.broadcast %86 : f32 to vector<1x32xf32>
    %90 = arith.select %88, %79, %89 : vector<1x32xi1>, vector<1x32xf32>
    %91 = arith.truncf %90 : vector<1x32xf32> to vector<1x32xbf16>
    %c23 = arith.constant 23 : index
    %c128_41 = arith.constant 128 : index
    %92 = vector.load %arg9[%c23, %c128_41] : memref<24x224xbf16, #tpu.memory_space<vmem>>, vector<1x32xbf16>
    tpu.vector_store %arg9[%c23, %c128_41], %91 {strides = array<i32>} : memref<24x224xbf16, #tpu.memory_space<vmem>>, vector<1x32xbf16>,
    %c0_42 = arith.constant 0 : index
    %c2_43 = arith.constant 2 : index
    %c0_44 = arith.constant 0 : index
    %93 = vector.load %arg3[%c0_42, %c2_43, %c0_44] : memref<1x24x32xf32, #tpu.memory_space<vmem>>, vector<1x22x32xf32>
    %94 = vector.shape_cast %93 : vector<1x22x32xf32> to vector<22x32xf32>
    %95 = vector.extract_strided_slice %4 {offsets = [2, 0], sizes = [22, 1], strides = [1, 1]} : vector<24x1xi32> to vector<22x1xi32>
    %c19_i32_45 = arith.constant 19 : i32
    %96 = vector.broadcast %c19_i32_45 : i32 to vector<22x1xi32>
    %97 = arith.cmpi slt, %95, %96 : vector<22x1xi32>
    %c0_i32_46 = arith.constant 0 : i32
    %98 = arith.sitofp %c0_i32_46 : i32 to f32
    %99 = vector.shape_cast %97 : vector<22x1xi1> to vector<22x1xi1>
    %100 = vector.broadcast %99 : vector<22x1xi1> to vector<22x32xi1>
    %101 = vector.broadcast %98 : f32 to vector<22x32xf32>
    %102 = arith.select %100, %94, %101 : vector<22x32xi1>, vector<22x32xf32>
    %103 = arith.truncf %102 : vector<22x32xf32> to vector<22x32xbf16>
    %c0_47 = arith.constant 0 : index
    %c160 = arith.constant 160 : index
    %104 = vector.load %arg9[%c0_47, %c160] : memref<24x224xbf16, #tpu.memory_space<vmem>>, vector<22x32xbf16>
    tpu.vector_store %arg9[%c0_47, %c160], %103 {strides = array<i32>} : memref<24x224xbf16, #tpu.memory_space<vmem>>, vector<22x32xbf16>,
    %c0_48 = arith.constant 0 : index
    %c0_49 = arith.constant 0 : index
    %c0_50 = arith.constant 0 : index
    %105 = vector.load %arg5[%c0_48, %c0_49, %c0_50] : memref<1x8x32xf32, #tpu.memory_space<vmem>>, vector<1x2x32xf32>
    %106 = vector.shape_cast %105 : vector<1x2x32xf32> to vector<2x32xf32>
    %c24_i32_51 = arith.constant 24 : i32
    %107 = arith.addi %0, %c24_i32_51 : i32
    %108 = vector.extract_strided_slice %1 {offsets = [0, 0], sizes = [2, 1], strides = [1, 1]} : vector<8x1xi32> to vector<2x1xi32>
    %109 = vector.broadcast %107 : i32 to vector<2x1xi32>
    %110 = arith.addi %109, %108 : vector<2x1xi32>
    %c19_i32_52 = arith.constant 19 : i32
    %111 = vector.broadcast %c19_i32_52 : i32 to vector<2x1xi32>
    %112 = arith.cmpi slt, %110, %111 : vector<2x1xi32>
    %c0_i32_53 = arith.constant 0 : i32
    %113 = arith.sitofp %c0_i32_53 : i32 to f32
    %114 = vector.shape_cast %112 : vector<2x1xi1> to vector<2x1xi1>
    %115 = vector.broadcast %114 : vector<2x1xi1> to vector<2x32xi1>
    %116 = vector.broadcast %113 : f32 to vector<2x32xf32>
    %117 = arith.select %115, %106, %116 : vector<2x32xi1>, vector<2x32xf32>
    %118 = arith.truncf %117 : vector<2x32xf32> to vector<2x32xbf16>
    %c22 = arith.constant 22 : index
    %c160_54 = arith.constant 160 : index
    %119 = vector.load %arg9[%c22, %c160_54] : memref<24x224xbf16, #tpu.memory_space<vmem>>, vector<2x32xbf16>
    tpu.vector_store %arg9[%c22, %c160_54], %118 {strides = array<i32>} : memref<24x224xbf16, #tpu.memory_space<vmem>>, vector<2x32xbf16>,
    %c0_55 = arith.constant 0 : index
    %c3_56 = arith.constant 3 : index
    %c0_57 = arith.constant 0 : index
    %120 = vector.load %arg3[%c0_55, %c3_56, %c0_57] : memref<1x24x32xf32, #tpu.memory_space<vmem>>, vector<1x21x32xf32>
    %121 = vector.shape_cast %120 : vector<1x21x32xf32> to vector<21x32xf32>
    %122 = vector.extract_strided_slice %4 {offsets = [3, 0], sizes = [21, 1], strides = [1, 1]} : vector<24x1xi32> to vector<21x1xi32>
    %c19_i32_58 = arith.constant 19 : i32
    %123 = vector.broadcast %c19_i32_58 : i32 to vector<21x1xi32>
    %124 = arith.cmpi slt, %122, %123 : vector<21x1xi32>
    %c0_i32_59 = arith.constant 0 : i32
    %125 = arith.sitofp %c0_i32_59 : i32 to f32
    %126 = vector.shape_cast %124 : vector<21x1xi1> to vector<21x1xi1>
    %127 = vector.broadcast %126 : vector<21x1xi1> to vector<21x32xi1>
    %128 = vector.broadcast %125 : f32 to vector<21x32xf32>
    %129 = arith.select %127, %121, %128 : vector<21x32xi1>, vector<21x32xf32>
    %130 = arith.truncf %129 : vector<21x32xf32> to vector<21x32xbf16>
    %c0_60 = arith.constant 0 : index
    %c192 = arith.constant 192 : index
    %131 = vector.load %arg9[%c0_60, %c192] : memref<24x224xbf16, #tpu.memory_space<vmem>>, vector<21x32xbf16>
    tpu.vector_store %arg9[%c0_60, %c192], %130 {strides = array<i32>} : memref<24x224xbf16, #tpu.memory_space<vmem>>, vector<21x32xbf16>,
    %c0_61 = arith.constant 0 : index
    %c0_62 = arith.constant 0 : index
    %c0_63 = arith.constant 0 : index
    %132 = vector.load %arg5[%c0_61, %c0_62, %c0_63] : memref<1x8x32xf32, #tpu.memory_space<vmem>>, vector<1x3x32xf32>
    %133 = vector.shape_cast %132 : vector<1x3x32xf32> to vector<3x32xf32>
    %c24_i32_64 = arith.constant 24 : i32
    %134 = arith.addi %0, %c24_i32_64 : i32
    %135 = vector.extract_strided_slice %1 {offsets = [0, 0], sizes = [3, 1], strides = [1, 1]} : vector<8x1xi32> to vector<3x1xi32>
    %136 = vector.broadcast %134 : i32 to vector<3x1xi32>
    %137 = arith.addi %136, %135 : vector<3x1xi32>
    %c19_i32_65 = arith.constant 19 : i32
    %138 = vector.broadcast %c19_i32_65 : i32 to vector<3x1xi32>
    %139 = arith.cmpi slt, %137, %138 : vector<3x1xi32>
    %c0_i32_66 = arith.constant 0 : i32
    %140 = arith.sitofp %c0_i32_66 : i32 to f32
    %141 = vector.shape_cast %139 : vector<3x1xi1> to vector<3x1xi1>
    %142 = vector.broadcast %141 : vector<3x1xi1> to vector<3x32xi1>
    %143 = vector.broadcast %140 : f32 to vector<3x32xf32>
    %144 = arith.select %142, %133, %143 : vector<3x32xi1>, vector<3x32xf32>
    %145 = arith.truncf %144 : vector<3x32xf32> to vector<3x32xbf16>
    %c21 = arith.constant 21 : index
    %c192_67 = arith.constant 192 : index
    %146 = vector.load %arg9[%c21, %c192_67] : memref<24x224xbf16, #tpu.memory_space<vmem>>, vector<3x32xbf16>
    tpu.vector_store %arg9[%c21, %c192_67], %145 {strides = array<i32>} : memref<24x224xbf16, #tpu.memory_space<vmem>>, vector<3x32xbf16>,
    %c0_68 = arith.constant 0 : index
    %c0_69 = arith.constant 0 : index
    %147 = vector.load %arg9[%c0_68, %c0_69] : memref<24x224xbf16, #tpu.memory_space<vmem>>, vector<24x224xbf16>
    %c0_70 = arith.constant 0 : index
    %c0_71 = arith.constant 0 : index
    %c0_72 = arith.constant 0 : index
    %148 = vector.load %arg6[%c0_70, %c0_71, %c0_72] : memref<1x224x32xbf16, #tpu.memory_space<vmem>>, vector<1x224x32xbf16>
    %149 = vector.shape_cast %148 : vector<1x224x32xbf16> to vector<224x32xbf16>
    %cst = arith.constant dense<0.000000e+00> : vector<24x32xf32>
    %150 = tpu.matmul %147, %149, %cst {dimension_numbers = #tpu.dot_dimension_numbers<[1], [0], [0], [1], [0, 0, 1, 1], [], []>} : vector<24x224xbf16>, vector<224x32xbf16>, vector<24x32xf32> -> vector<24x32xf32>
    %c0_73 = arith.constant 0 : index
    %c0_74 = arith.constant 0 : index
    %c0_75 = arith.constant 0 : index
    %151 = vector.load %arg7[%c0_73, %c0_74, %c0_75] : memref<1x1x32xf32, #tpu.memory_space<vmem>>, vector<1x1x32xf32>
    %152 = vector.shape_cast %151 : vector<1x1x32xf32> to vector<1x32xf32>
    %153 = vector.broadcast %152 : vector<1x32xf32> to vector<24x32xf32>
    %154 = arith.addf %150, %153 : vector<24x32xf32>
    %c0_76 = arith.constant 0 : index
    %c0_77 = arith.constant 0 : index
    %c0_78 = arith.constant 0 : index
    %155 = vector.load %arg8[%c0_76, %c0_77, %c0_78] : memref<1x24x32xf32, #tpu.memory_space<vmem>>, vector<1x24x32xf32>
    %156 = vector.shape_cast %155 : vector<1x24x32xf32> to vector<24x32xf32>
    %157 = vector.shape_cast %154 : vector<24x32xf32> to vector<1x24x32xf32>
    tpu.vector_store %arg8[%c0_76, %c0_77, %c0_78], %157 {strides = array<i32>} : memref<1x24x32xf32, #tpu.memory_space<vmem>>, vector<1x24x32xf32>,
    return
  }
  func.func @transform_0(%arg0: i32, %arg1: i32, %arg2: i32) -> (i32, i32, i32) {
    %c0_i32 = arith.constant 0 : i32
    return %arg0, %arg2, %arg1 : i32, i32, i32
  }
  func.func @transform_1(%arg0: i32, %arg1: i32, %arg2: i32) -> (i32, i32, i32) {
    %c3_i32 = arith.constant 3 : i32
    %0 = arith.muli %arg2, %c3_i32 : i32
    %c1_i32 = arith.constant 1 : i32
    %1 = arith.subi %0, %c1_i32 : i32
    %c0_i32 = arith.constant 0 : i32
    %2 = arith.maxsi %1, %c0_i32 : i32
    %c0_i32_0 = arith.constant 0 : i32
    return %arg0, %2, %arg1 : i32, i32, i32
  }
  func.func @transform_2(%arg0: i32, %arg1: i32, %arg2: i32) -> (i32, i32, i32) {
    %c1_i32 = arith.constant 1 : i32
    %0 = arith.addi %arg2, %c1_i32 : i32
    %c3_i32 = arith.constant 3 : i32
    %1 = arith.muli %0, %c3_i32 : i32
    %c2_i32 = arith.constant 2 : i32
    %2 = arith.minsi %1, %c2_i32 : i32
    %c0_i32 = arith.constant 0 : i32
    return %arg0, %2, %arg1 : i32, i32, i32
  }
  func.func @transform_3(%arg0: i32, %arg1: i32, %arg2: i32) -> (i32, i32, i32) {
    %c0_i32 = arith.constant 0 : i32
    %c0_i32_0 = arith.constant 0 : i32
    %c0_i32_1 = arith.constant 0 : i32
    return %arg1, %c0_i32, %c0_i32_0 : i32, i32, i32
  }
  func.func @transform_4(%arg0: i32, %arg1: i32, %arg2: i32) -> (i32, i32, i32) {
    %c0_i32 = arith.constant 0 : i32
    %c0_i32_0 = arith.constant 0 : i32
    %c0_i32_1 = arith.constant 0 : i32
    return %arg1, %c0_i32, %c0_i32_0 : i32, i32, i32
  }
  func.func @transform_5(%arg0: i32, %arg1: i32, %arg2: i32) -> (i32, i32, i32) {
    %c0_i32 = arith.constant 0 : i32
    return %arg0, %arg2, %arg1 : i32, i32, i32
  }
}

</mosaic_0001>

<bundles_post_ra>
// kernel: tpu_custom_call.1
= control target key start
LH: loop header
LB: loop body
LE: loop exit
PB: predicated region body
PF: predicated region fallthrough
CT: control target
= control target key end

     0   :  { %s1558_s18 = smov 0   ;;  %s1560_s19 = smov 0   ;;  %s1911_s0 = inlined_call_operand.vmem [shape: f32[2,19,32], index: 0, kind: input, shape index: {}]   ;;  %s1912_s1 = inlined_call_operand.vmem [shape: f32[2,19,32], index: 1, kind: input, shape index: {}]   ;;  %s1913_s2 = inlined_call_operand.vmem [shape: f32[2,19,32], index: 2, kind: input, shape index: {}]   ;;  %s1914_s3 = inlined_call_operand.vmem [shape: bf16[1,224,32], index: 3, kind: input, shape index: {}]   ;;  %s1915_s4 = inlined_call_operand.vmem [shape: f32[1,1,32], index: 4, kind: input, shape index: {}]   ;;  %s1916_s5 = inlined_call_operand.vmem [shape: f32[2,19,32], index: 5, kind: output, shape index: {}]  }
   0x1   :  { %s1562_s20 = smov 0  }
   0x2 LB: > { %s34_s2 = sadd.s32 1, %s1517_s19  ;;  %p1342_p0 = scmp.ge.s32.totalorder %s1521_s20, 1  ;;  %s1521_s20 = sphi %s1562_s20, %s15_s20   ;;  %s1517_s19 = sphi %s1560_s19, %s1934_s19   ;;  %s1513_s18 = sphi %s1558_s18, %s1933_s18  }
   0x3   : > { %p36_p1 = scmp.ge.s32.totalorder %s34_s2, 2  ;;  %p312_p2 = scmp.lt.s32.totalorder %s1521_s20, 3 }
   0x5   : > { %s1936_s2 = smov (%p36_p1, %s34_s2), 0  ;;  %p313_p3 = pnand %p1342_p0, %p312_p2 }
   0x6   : > { %p393_p4 = scmp.lt.s32.totalorder (!%p313_p3), %s1513_s18, 1  ;;  %v466_v0 = vlaneseq (!%p313_p3)  ;;  %v1523_v1 = vmov (!%p313_p3), 0.0|0.0   ;;  %vm574_vm0 = vcmask (!%p313_p3), 1040384   ;;  %v1480_v5 = vld [vmem:[%s1914_s3] sm:$0xff] (!%p313_p3)   ;;  %vm575_vm1 = vcmask (!%p313_p3), 1044484   ;;  %s1524_s24 = smov (!%p313_p3), 32  }
   0x7   : > { %316 = sbr.rel (%p313_p3) target bundleno = 401 (0x191), region = 40  ;;  %v1576_v2 = vcombine.low (!%p313_p3), %v1523_v1, %v1523_v1  ;;  %vm614_vm2 = vsmask.f32 (!%p313_p3), 256  ;;  %vm632_vm3 = vsmask.f32 (!%p313_p3), 4368  ;;  %vm811_vm6 = vcmask (!%p313_p3), 1041408   ;;  %vm1635_vm9 = vmor (!%p313_p3), %vm574_vm0, %vm575_vm1 }
   0x8   : > { %v467_v3 = vshrl.u32 (!%p313_p3), %v466_v0, 7  ;;  %v1525_v9 = vmov (!%p313_p3), 0   ;;  %vm834_vm7 = vcmask (!%p313_p3), 1046532   ;;  %v1481_v18 = vld [vmem:[%s1914_s3 + $0x8] sm:$0xff] (!%p313_p3)   ;;  %vm833_vm8 = vcmask (!%p313_p3), 1042432   ;;  %s1526_s8 = smov (!%p313_p3), 64   ;;  %vm1653_vm11 = vmor (!%p313_p3), %vm614_vm2, %vm632_vm3 }
   0x9   : > { %v863_v4 = vrot.slane (!%p313_p3), %v1576_v2, 5  ;;  %v952_v8 = vshrl.u32 (!%p313_p3), %v1576_v2, 16  ;;  %1112 = vmatprep.subr.bf16.mxu0 (!%p313_p3), %v1525_v9  ;;  %1422 = vmatprep.subr.bf16.mxu1 (!%p313_p3), %v1525_v9  ;;  %v795_v12 = vshll.u32 (!%p313_p3), %v1576_v2, 16  ;;  %v1482_v58 = vld [vmem:[%s1914_s3 + $0x10] sm:$0xff] (!%p313_p3)   ;;  %vm1691_vm13 = vmor (!%p313_p3), %vm833_vm8, %vm834_vm7  ;;  %vm897_vm14 = vsmask.f32 (!%p313_p3), 2304 }
   0xa   : > { %v547_v6 = vadd.s32 (!%p313_p3), 4294967294, %v467_v3  ;;  %v601_v7 = vadd.s32 (!%p313_p3), 4294967295, %v467_v3  ;;  %1113 = vmatpush1.bf16.msra.mxu0 (!%p313_p3), %v1480_v5  ;;  %1436 = vmatpush1.bf16.msra.mxu1 (!%p313_p3), %v1480_v5  ;;  %v1603_v13 = vadd.s32 (!%p313_p3), 4294967293, %v467_v3  ;;  %v1618_v24 = vadd.s32 (!%p313_p3), 16, %v467_v3  ;;  %v486_v5 = vld [vmem:[#allocation2] sm:$0x3] (!%p313_p3) }
   0xb   : > { %864 = vrot.lane.b32.xlu1 (!%p313_p3), %v863_v4, %s1524_s24  ;;  %1114 = vmatprep.subr.bf16.mxu0 (!%p313_p3), %v1525_v9  ;;  %v1624_v29 = vrot.slane (!%p313_p3), %v952_v8, 5  ;;  %vm898_vm15 = vsmask.f32 (!%p313_p3), 6416  ;;  %vm740_vm1 = vsmask.f32 (!%p313_p3), 3328  ;;  %s1527_s21 = smov (!%p313_p3), 96  }
   0xc   : > { %vm548_vm4 = vcmp.ge.s32.totalorder (!%p313_p3), %v547_v6, 0  ;;  %vm602_vm5 = vcmp.ge.s32.totalorder (!%p313_p3), %v601_v7, 0  ;;  %1423 = vmatprep.subr.bf16.mxu1 (!%p313_p3), %v1525_v9  ;;  %vm708_vm10 = vcmp.lt.s32.totalorder (!%p313_p3), %v1618_v24, 19  ;;  %vm478_vm12 = vcmp.ge.s32.totalorder (!%p313_p3), %v1603_v13, 0  ;;  %v1483_v7 = vld [vmem:[%s1914_s3 + $0x18] sm:$0xff] (!%p313_p3)  }
   0xd   : > { %v779_v13 = vld [vmem:[#allocation2 + $0x14] sm:$0xf] (!%p313_p3)  ;;  %vm541_vm3 = vcmask (!%p313_p3), 257024  }
   0xe   : > { %s1938_s18 = smov (!%p393_p4, %s1513_s18), 1  ;;  %1115 = vmatpush1.bf16.msra.mxu0 %v1481_v18  ;;  %1437 = vmatpush1.bf16.msra.mxu1 %v1481_v18 }
   0xf   : > { %s1582_s23 = smul.u32 24, %s1938_s18  ;;  %1116 = vmatprep.subr.bf16.mxu0 %v1525_v9  ;;  %1424 = vmatprep.subr.bf16.mxu1 %v1525_v9 }
  0x11   : > { %s1589_s27 = scalar_lea.vmem %s1912_s1, %s1582_s23  ;;  %s1595_s30 = scalar_lea.vmem %s1911_s0, %s1582_s23 }
  0x12   : > { %v544_v10 = vld [vmem:[%s1589_s27 + $0x6] sm:$0x3]  ;;  %v562_v17 = vld [vmem:[%s1595_s30 + $0x8] sm:$0xff]  ;;  %v705_v23 = vld [vmem:[%s1595_s30 + $0x11] sm:$0x7f]  ;;  %1117 = vmatpush1.bf16.msra.mxu0 %v1482_v58  ;;  %1438 = vmatpush1.bf16.msra.mxu1 %v1482_v58  ;;  %v1741_v58 = vrot.slane %v795_v12, 6  ;;  %s462_s16 = scalar_lea.vmem %s1916_s5, %s1582_s23 }
  0x13   : > { %v598_v11 = vld [vmem:[%s1589_s27 + $0x7] sm:$0x1]  ;;  %v551_v14 = vsel %vm548_vm4, %v544_v10, 0.0  ;;  %v1615_v22 = vld [vmem:[%s1595_s30 + $0x9] sm:$0xff]  ;;  %v1621_v26 = vpack.c.bf16 %v562_v17, %v562_v17  ;;  %v722_v28 = vrot.slane %v705_v23, 7  ;;  %1118 = vmatprep.subr.bf16.mxu0 %v1525_v9  ;;  %1425 = vmatprep.subr.bf16.mxu1 %v1525_v9  ;;  %vm778_vm4 = vmand %vm541_vm3, %vm740_vm1 }
  0x14   : > { %v605_v15 = vsel %vm602_vm5, %v598_v11, 0.0  ;;  %v561_v16 = vld [vmem:[%s1595_s30] sm:$0xff]  ;;  %v1402_v19 = vpack.c.bf16 %v551_v14, %v551_v14  ;;  %v806_v25 = vld [vmem:[%s1595_s30 + $0xa] sm:$0xff]  ;;  %v720_v27 = vrot.slane %v1615_v22, 7  ;;  %v807_v33 = vld [vmem:[%s1595_s30 + $0x12] sm:$0x3f] }
  0x15   : > { %v1406_v20 = vpack.c.bf16 %v605_v15, %v605_v15  ;;  %v1612_v21 = vpack.c.bf16 %v561_v16, %v561_v16  ;;  %v805_v34 = vld [vmem:[%s1595_s30 + $0x2] sm:$0xff]  ;;  %v579_v36 = vrot.slane %v1621_v26, 7  ;;  %v643_v38 = vshrl.u32 %v1621_v26, 16  ;;  %v870_v53 = vld [vmem:[%s1595_s30 + $0xb] sm:$0xff]  ;;  %v871_v63 = vld [vmem:[%s1595_s30 + $0x13] sm:$0x1f] }
  0x16   : > { %556 = vrot.lane.b32.xlu0 %v1402_v19, %s1524_s24  ;;  %v723_v37 = vsel %vm574_vm0, %v720_v27, %v722_v28  ;;  %v813_v39 = vrot.slane %v806_v25, 6  ;;  %v703_v41 = vld [vmem:[%s1595_s30 + $0x1] sm:$0xff]  ;;  %v646_v43 = vshll.u32 %v1621_v26, 16  ;;  %v815_v47 = vrot.slane %v807_v33, 6  ;;  %v563_v6 = vld [vmem:[%s1595_s30 + $0x10] sm:$0x3f]  ;;  %1119 = vmatpush1.bf16.msra.mxu0 %v1483_v7 }
  0x17   : > { %610 = vrot.lane.b32.xlu1 %v1406_v20, %s1526_s8  ;;  %v577_v30 = vrot.slane %v1612_v21, 7  ;;  %v635_v31 = vshrl.u32 %v1612_v21, 16  ;;  %v638_v32 = vshll.u32 %v1612_v21, 16  ;;  %v1659_v45 = vrot.slane %v643_v38, 7  ;;  %v869_v49 = vld [vmem:[%s1595_s30 + $0x3] sm:$0xff]  ;;  %1439 = vmatpush1.bf16.msra.mxu1 %v1483_v7 }
  0x18   : > { %v729_v46 = vsel %vm708_vm10, %v723_v37, 0.0  ;;  %v812_v48 = vrot.slane %v805_v34, 6  ;;  %v816_v56 = vsel %vm811_vm6, %v813_v39, %v815_v47  ;;  %v1682_v59 = vrot.slane %v703_v41, 7  ;;  %v621_v19 = vld [vmem:[%s1595_s30 + $0x10] sm:$0x7f]  ;;  %v1484_v37 = vld [vmem:[%s1914_s3 + $0x20] sm:$0xff]   ;;  %1120 = vmatprep.subr.bf16.mxu0 %v1525_v9  ;;  %1426 = vmatprep.subr.bf16.mxu1 %v1525_v9 }
  0x19   : > { %v578_v40 = vrot.slane %v577_v30, 4  ;;  %v637_v42 = vrot.slane %v635_v31, 7  ;;  %v648_v54 = vor.u32 %v646_v43, %v1659_v45  ;;  %v1415_v55 = vpack.c.bf16 %v729_v46, %v729_v46  ;;  %v474_v46 = vld [vmem:[%s1589_s27 + $0x5] sm:$0x7] }
  0x1a   : > { %v814_v57 = vsel %vm811_vm6, %v812_v48, %v813_v39  ;;  %v822_v60 = vsel %vm708_vm10, %v816_v56, 0.0  ;;  %v1416_v61 = vpack.c.bf16 %v812_v48, %v812_v48  ;;  %v876_v11 = vrot.slane %v869_v49, 5  ;;  %1121 = vmatpush1.bf16.msra.mxu0 %v1484_v37 }
  0x1b   : > { %v580_v50 = vsel %vm1635_vm9, %v578_v40, %v579_v36  ;;  %584 = vrot.lane.b32.xlu1 %v577_v30, %s1524_s24  ;;  %v641_v51 = vrot.slane %v637_v42, 4  ;;  %v640_v52 = vor.u32 %v638_v32, %v637_v42  ;;  %v1417_v62 = vpack.c.bf16 %v814_v57, %v814_v57  ;;  %1440 = vmatpush1.bf16.msra.mxu1 %v1484_v37 }
  0x1c   : > { %586 = vrot.lane.b32.xlu0 %v580_v50, %s1524_s24  ;;  %v763_v1 = vshll.u32 %v1415_v55, 16  ;;  %v767_v3 = vshrl.u32 %v1415_v55, 16  ;;  %v1418_v4 = vpack.c.bf16 %v822_v60, %v822_v60  ;;  %v1368_v8 = vrot.slane %v1416_v61, 9  ;;  %v1485_v55 = vld [vmem:[%s1914_s3 + $0x28] sm:$0xff]   ;;  %1122 = vmatprep.subr.bf16.mxu0 %v1525_v9 }
  0x1d   : > { %v649_v0 = vsel %vm1653_vm11, %v641_v51, %v648_v54  ;;  %v838_v10 = vrot.slane %v1417_v62, 5  ;;  %v877_v14 = vrot.slane %v870_v53, 5  ;;  %v879_v18 = vrot.slane %v871_v63, 5  ;;  %1427 = vmatprep.subr.bf16.mxu1 %v1525_v9 }
  0x1e   : > { %v1702_v15 = vrot.slane %v763_v1, 5  ;;  %v769_v16 = vrot.slane %v767_v3, 4  ;;  %v841_v17 = vrot.slane %v1418_v4, 5  ;;  %v1405_v28 = vpack.c.bf16 %v563_v6, %v563_v6  ;;  %1123 = vmatpush1.bf16.msra.mxu0 %v1485_v55 }
  0x1f   : > { %659 = vrot.lane.b32.xlu1 %v640_v52, %s1526_s8  ;;  %v839_v20 = vsel %vm1691_vm13, %v1368_v8, %v838_v10  ;;  %v878_v23 = vsel %vm833_vm8, %v876_v11, %v877_v14  ;;  %v840_v25 = vrot.slane %v838_v10, 4  ;;  %v880_v33 = vsel %vm833_vm8, %v877_v14, %v879_v18  ;;  %1441 = vmatpush1.bf16.msra.mxu1 %v1485_v55 }
  0x20   : > { %661 = vrot.lane.b32.xlu0 %v649_v0, %s1526_s8  ;;  %v843_v30 = vrot.slane %v841_v17, 4  ;;  %v1420_v34 = vpack.c.bf16 %v878_v23, %v878_v23  ;;  %v721_v39 = vsel %vm574_vm0, %v1682_v59, %v720_v27  ;;  %v886_v40 = vsel %vm708_vm10, %v880_v33, 0.0  ;;  %vm1752_vm0 = vmor %vm897_vm14, %vm898_vm15  ;;  %1124 = vmatprep.subr.bf16.mxu0 %v1525_v9 }
  0x21   : > { %v581_v41 = vrot.slane %v579_v36, 4  ;;  %v582_v42 = vrot.slane %v1405_v28, 7  ;;  %v770_v47 = vor.u32 %v769_v16, %v1702_v15  ;;  %v1421_v22 = vpack.c.bf16 %v886_v40, %v886_v40  ;;  %1428 = vmatprep.subr.bf16.mxu1 %v1525_v9 }
  0x22   : > { %v910_v48 = vshrl.u32 %v1420_v34, 16  ;;  %v913_v49 = vshll.u32 %v1420_v34, 16  ;;  %v842_v24 = vsel %vm1691_vm13, %v840_v25, %v841_v17  ;;  %v1419_v36 = vpack.c.bf16 %v876_v11, %v876_v11  ;;  %v1486_v11 = vld [vmem:[%s1914_s3 + $0x30] sm:$0xff]  }
  0x23   : > { %844 = vrot.lane.b32.xlu1 %v839_v20, %s1524_s24  ;;  %v583_v27 = vsel %vm1635_vm9, %v581_v41, %v582_v42  ;;  %v1731_v50 = vpack.c.bf16 %v621_v19, %v621_v19  ;;  %v920_v51 = vshrl.u32 %v1421_v22, 16  ;;  %v923_v52 = vshll.u32 %v1421_v22, 16  ;;  %v1487_v19 = vld [vmem:[%s1914_s3 + $0x38] sm:$0xff]   ;;  %1125 = vmatpush1.bf16.msra.mxu0 %v1486_v11 }
  0x24   : > { %848 = vrot.lane.b32.xlu0 %v843_v30, %s1524_s24  ;;  %v912_v53 = vrot.slane %v910_v48, 5  ;;  %v915_v54 = vrot.slane %v913_v49, 6  ;;  %v481_v56 = vsel %vm478_vm12, %v474_v46, 0.0  ;;  %v901_v35 = vshrl.u32 %v1419_v36, 16  ;;  %v491_v30 = vld [vmem:[%s1595_s30 + $0x10] sm:$0x1f]  ;;  %1126 = vmatprep.subr.bf16.mxu0 %v1525_v9 }
  0x25   : > { %v904_v57 = vshll.u32 %v1419_v36, 16  ;;  %v1744_v60 = vpack.c.bf16 %v721_v39, %v721_v39  ;;  %v922_v61 = vrot.slane %v920_v51, 5  ;;  %v925_v62 = vrot.slane %v923_v52, 6  ;;  %1442 = vmatpush1.bf16.msra.mxu1 %v1486_v11  ;;  %v1493_v11 = vld [vmem:[%s1914_s3 + $0x68] sm:$0xff]  }
  0x26   : > { %v1747_v63 = vor.u32 %v915_v54, %v912_v53  ;;  %v771_v0 = vrot.slane %v770_v47, 4  ;;  %v903_v3 = vrot.slane %v901_v35, 5  ;;  %v482_v6 = vpack.c.bf16 %v481_v56, %v481_v56  ;;  %1429 = vmatprep.subr.bf16.mxu1 %v1525_v9  ;;  %v1489_v56 = vld [vmem:[%s1914_s3 + $0x48] sm:$0xff]   ;;  %v679_v35 = vld [vmem:[%s1595_s30 + $0x10] sm:$0xff] }
  0x27   : > { %588 = vrot.lane.b32.xlu1 %v583_v27, %s1524_s24  ;;  %v906_v4 = vrot.slane %v904_v57, 6  ;;  %v926_v7 = vor.u32 %v925_v62, %v922_v61  ;;  %v652_v10 = vshrl.u32 %v1731_v50, 16  ;;  %v1765_v16 = vrot.slane %v795_v12, 5  ;;  %1127 = vmatpush1.bf16.msra.mxu0 %v1487_v19 }
  0x28   : > { %846 = vrot.lane.b32.xlu0 %v842_v24, %s1524_s24  ;;  %v918_v8 = vrot.slane %v1747_v63, 4  ;;  %vm483_vm5 = vcmask 254976   ;;  %vm484_vm6 = vsmask.f32 1280  ;;  %v757_v2 = vshrl.u32 %v1744_v60, 16  ;;  %1128 = vmatprep.subr.bf16.mxu0 %v1525_v9 }
  0x29   : > { %v907_v14 = vor.u32 %v906_v4, %v903_v3  ;;  %v928_v17 = vrot.slane %v926_v7, 4  ;;  %v958_v12 = vor.u32 %v1741_v58, %v1624_v29  ;;  %v655_v20 = vshll.u32 %v1731_v50, 16  ;;  %vm485_vm7 = vmand %vm483_vm5, %vm484_vm6  ;;  %1443 = vmatpush1.bf16.msra.mxu1 %v1487_v19 }
  0x2a   : > { %v927_v18 = vsel %vm1752_vm0, %v918_v8, %v926_v7  ;;  %v780_v23 = vsel %vm778_vm4, %v771_v0, %v779_v13  ;;  %v654_v25 = vrot.slane %v652_v10, 7  ;;  %vm800_vm8 = vsmask.f32 7950  ;;  %1430 = vmatprep.subr.bf16.mxu1 %v1525_v9  ;;  %v1492_v10 = vld [vmem:[%s1914_s3 + $0x60] sm:$0xff]  }
  0x2b   : > { %692 = vrot.lane.b32.xlu1 %v1621_v26, %s1527_s21  ;;  %781 = vst [vmem:[#allocation2 + $0x14] sm:$0xf] %v780_v23  ;;  %v487_v28 = vsel %vm485_vm7, %v482_v6, %v486_v5  ;;  %v908_v33 = vrot.slane %v907_v14, 4  ;;  %vm799_vm9 = vcmask 257027   ;;  %vm535_vm10 = vcmask 257025   ;;  %v1490_v5 = vld [vmem:[%s1914_s3 + $0x50] sm:$0xff]  }
  0x2c   : > { %933 = vrot.lane.b32.xlu0 %v928_v17, %s1526_s8  ;;  %488 = vst [vmem:[#allocation2] sm:$0x3] %v487_v28  ;;  %vm536_vm12 = vsmask.f32 7942  ;;  %v507_v29 = vrot.slane %v635_v31, 6  ;;  %v759_v34 = vrot.slane %v757_v2, 4  ;;  %v657_v40 = vor.u32 %v655_v20, %v654_v25  ;;  %vm1794_vm15 = vmand %vm799_vm9, %vm800_vm8 }
  0x2d   : > { %v650_v37 = vrot.slane %v1659_v45, 4  ;;  %v510_v39 = vrot.slane %v638_v32, 7  ;;  %vm502_vm13 = vsmask.f32 5392  ;;  %v516_v31 = vrot.slane %v643_v38, 6  ;;  %vm1813_vm4 = vmand %vm535_vm10, %vm536_vm12 }
  0x2e   : > { %v519_v45 = vrot.slane %v646_v43, 7  ;;  %v1413_v32 = vpack.c.bf16 %v1682_v59, %v1682_v59  ;;  %v917_v42 = vsel %vm1752_vm0, %v908_v33, %v1747_v63  ;;  %v753_v43 = vshll.u32 %v1744_v60, 16  ;;  %vm1821_vm5 = vmor %vm484_vm6, %vm502_vm13 }
  0x2f   : > { %931 = vrot.lane.b32.xlu1 %v927_v18, %s1526_s8  ;;  %v511_v26 = vor.u32 %v510_v39, %v507_v29  ;;  %v1401_v59 = vpack.c.bf16 %v491_v30, %v491_v30  ;;  %vm741_vm0 = vsmask.f32 7440  ;;  %v658_v51 = vsel %vm1653_vm11, %v650_v37, %v657_v40 }
  0x30   : > { %690 = vrot.lane.b32.xlu0 %v1612_v21, %s1527_s21  ;;  %v1488_v21 = vld [vmem:[%s1914_s3 + $0x40] sm:$0xff]   ;;  %v520_v47 = vor.u32 %v519_v45, %v516_v31  ;;  %v744_v22 = vshrl.u32 %v1413_v32, 16  ;;  %v747_v48 = vshll.u32 %v1413_v32, 16  ;;  %v755_v27 = vrot.slane %v753_v43, 5  ;;  %vm1844_vm11 = vmor %vm740_vm1, %vm741_vm0 }
  0x31   : > { %v512_v24 = vrot.slane %v511_v26, 4  ;;  %v524_v36 = vshrl.u32 %v1401_v59, 16  ;;  %v527_v50 = vshll.u32 %v1401_v59, 16  ;;  %1129 = vmatpush1.bf16.msra.mxu0 %v1488_v21  ;;  %1444 = vmatpush1.bf16.msra.mxu1 %v1488_v21  ;;  %v1412_v1 = vpack.c.bf16 %v679_v35, %v679_v35 }
  0x32   : > { %v802_v49 = vld [vmem:[#allocation2 + $0x14] sm:$0x8]  ;;  %v746_v54 = vrot.slane %v744_v22, 4  ;;  %v749_v55 = vrot.slane %v747_v48, 5  ;;  %v760_v58 = vor.u32 %v759_v34, %v755_v27  ;;  %1130 = vmatprep.subr.bf16.mxu0 %v1525_v9  ;;  %v522_v63 = vrot.slane %v520_v47, 4  ;;  %1431 = vmatprep.subr.bf16.mxu1 %v1525_v9 }
  0x33   : > { %959 = vrot.lane.b32.xlu1 %v958_v12, %s1526_s8  ;;  %v803_v52 = vsel %vm1794_vm15, %v1765_v16, %v802_v49  ;;  %v538_v53 = vld [vmem:[#allocation2] sm:$0xe]  ;;  %v521_v44 = vsel %vm1821_vm5, %v512_v24, %v520_v47  ;;  %v526_v60 = vrot.slane %v524_v36, 6  ;;  %v529_v13 = vrot.slane %v527_v50, 7  ;;  %v1374_v48 = vld [vmem:[%s1915_s4] ss:$0 sm:$0xff] }
  0x34   : > { %929 = vrot.lane.b32.xlu0 %v917_v42, %s1526_s8  ;;  %804 = vst [vmem:[#allocation2 + $0x14] sm:$0x8] %v803_v52  ;;  %v539_v57 = vsel %vm1813_vm4, %v511_v26, %v538_v53  ;;  %542 = vst.msk [vmem:[#allocation2 + $0x8] sm:$0xf] %vm541_vm3, %v521_v44  ;;  %v750_v62 = vor.u32 %v749_v55, %v746_v54  ;;  %v761_v0 = vrot.slane %v760_v58, 4  ;;  %vm867_vm1 = vcmask 519427  }
  0x35   : > { %540 = vst [vmem:[#allocation2] sm:$0xe] %v539_v57  ;;  %v530_v4 = vor.u32 %v529_v13, %v526_v60  ;;  %1131 = vmatpush1.bf16.msra.mxu0 %v1489_v56  ;;  %1445 = vmatpush1.bf16.msra.mxu1 %v1489_v56  ;;  %vm593_vm6 = vcmask 519425   ;;  %vm613_vm7 = vcmask 778752   ;;  %vm595_vm8 = vcmask 519424  }
  0x36   : > { %v751_v3 = vrot.slane %v750_v62, 4  ;;  %v766_v6 = vsel %vm1844_vm11, %v761_v0, %v1702_v15  ;;  %1132 = vmatprep.subr.bf16.mxu0 %v1525_v9  ;;  %1432 = vmatprep.subr.bf16.mxu1 %v1525_v9  ;;  %v1491_v15 = vld [vmem:[%s1914_s3 + $0x58] sm:$0xff]   ;;  %vm615_vm9 = vmand %vm613_vm7, %vm614_vm2  ;;  %vm668_vm10 = vcmask 781824   ;;  %vm855_vm12 = vcmask 518400  }
  0x37   : > { %776 = vst.msk [vmem:[#allocation2 + $0xc] sm:$0xf] %vm541_vm3, %v766_v6  ;;  %v531_v8 = vsel %vm1821_vm5, %v522_v63, %v530_v4  ;;  %vm669_vm13 = vsmask.f32 7938  ;;  %vm940_vm2 = vcmask 780800   ;;  %vm699_vm4 = vcmask 1044224  }
  0x38   : > { %663 = vrot.lane.b32.xlu0 %v658_v51, %s1526_s8  ;;  %v756_v7 = vsel %vm1844_vm11, %v751_v3, %v755_v27  ;;  %543 = vst.msk [vmem:[#allocation2 + $0x10] sm:$0xf] %vm541_vm3, %v531_v8  ;;  %vm670_vm15 = vmand %vm668_vm10, %vm669_vm13  ;;  %vm962_vm0 = vcmask 781826   ;;  %vm963_vm11 = vsmask.f32 7946 }
  0x39   : > { %775 = vst.msk [vmem:[#allocation2 + $0x4] sm:$0xf] %vm541_vm3, %v756_v7  ;;  %1133 = vmatpush1.bf16.msra.mxu0 %v1490_v5  ;;  %1446 = vmatpush1.bf16.msra.mxu1 %v1490_v5  ;;  %vm559_vm3 = vcmask 516352   ;;  %vm941_vm5 = vmand %vm940_vm2, %vm897_vm14  ;;  %vm1105_vm14 = vcmask 785408  }
  0x3a   : > { %1134 = vmatprep.subr.bf16.mxu0 %v1525_v9  ;;  %1433 = vmatprep.subr.bf16.mxu1 %v1525_v9 }
  0x3c   : > { %694 = vrot.lane.b32.xlu0 %v1412_v1, %s1527_s21 }
  0x3d   : > { %1135 = vmatpush1.bf16.msra.mxu0 %v1491_v15  ;;  %1447 = vmatpush1.bf16.msra.mxu1 %v1491_v15 }
  0x3e   : > { %1136 = vmatprep.subr.bf16.mxu0 %v1525_v9  ;;  %1434 = vmatprep.subr.bf16.mxu1 %v1525_v9 }
  0x41   : > { %1137 = vmatpush1.bf16.msra.mxu0 %v1492_v10  ;;  %1448 = vmatpush1.bf16.msra.mxu1 %v1492_v10 }
  0x42   : > { %1138 = vmatprep.subr.bf16.mxu0 %v1525_v9  ;;  %1435 = vmatprep.subr.bf16.mxu1 %v1525_v9 }
  0x45   : > { %1139 = vmatpush1.bf16.msra.mxu0 %v1493_v11  ;;  %1449 = vmatpush1.bf16.msra.mxu1 %v1493_v11 }
  0x7d   : > { %v865_v14 = vpop.permute.xlu1 %864 }
  0x7e   : > { %868 = vst.msk [vmem:[#allocation2 + $0x14] sm:$0x8] %vm867_vm1, %v865_v14  ;;  %vm964_vm1 = vmand %vm962_vm0, %vm963_vm11 }
  0x88   : > { %v557_v16 = vpop.permute.xlu0 %556 }
  0x89   : > { %v611_v17 = vpop.permute.xlu1 %610  ;;  %560 = vst.msk [vmem:[#allocation2] sm:$0x1] %vm559_vm3, %v557_v16  ;;  %vm1160_vm3 = vcmask 261120  }
  0x8d   : > { %v585_v18 = vpop.permute.xlu1 %584 }
  0x8e   : > { %v587_v19 = vpop.permute.xlu0 %586  ;;  %594 = vst.msk [vmem:[#allocation2] sm:$0xe] %vm593_vm6, %v585_v18 }
  0x8f   : > { %596 = vst.msk [vmem:[#allocation2 + $0x8] sm:$0xf] %vm595_vm8, %v587_v19 }
  0x90   : > { %v616_v9 = vld [vmem:[#allocation2] sm:$0x1] }
  0x91   : > { %v660_v2 = vpop.permute.xlu1 %659  ;;  %v617_v12 = vsel %vm615_vm9, %v611_v17, %v616_v9 }
  0x92   : > { %v662_v20 = vpop.permute.xlu0 %661  ;;  %618 = vst [vmem:[#allocation2] sm:$0x1] %v617_v12 }
  0x93   : > { %675 = vst.msk [vmem:[#allocation2 + $0x8] sm:$0xf] %vm668_vm10, %v662_v20 }
  0x95   : > { %v845_v23 = vpop.permute.xlu1 %844 }
  0x96   : > { %v849_v25 = vpop.permute.xlu0 %848  ;;  %853 = vst.msk [vmem:[#allocation2 + $0x4] sm:$0xf] %vm595_vm8, %v845_v23 }
  0x97   : > { %856 = vst.msk [vmem:[#allocation2 + $0x14] sm:$0x7] %vm855_vm12, %v849_v25 }
  0x99   : > { %v589_v28 = vpop.permute.xlu1 %588  ;;  %v671_v30 = vld [vmem:[#allocation2] sm:$0xf] }
  0x9a   : > { %v847_v33 = vpop.permute.xlu0 %846  ;;  %597 = vst.msk [vmem:[#allocation2 + $0x10] sm:$0xf] %vm595_vm8, %v589_v28  ;;  %v672_v29 = vsel %vm670_vm15, %v660_v2, %v671_v30 }
  0x9b   : > { %854 = vst.msk [vmem:[#allocation2 + $0xc] sm:$0xf] %vm595_vm8, %v847_v33  ;;  %673 = vst [vmem:[#allocation2] sm:$0xf] %v672_v29 }
  0x9d   : > { %v693_v34 = vpop.permute.xlu1 %692 }
  0x9e   : > { %v942_v37 = vld [vmem:[#allocation2 + $0x14] sm:$0x7]  ;;  %701 = vst.msk [vmem:[#allocation2 + $0x8] sm:$0xf] %vm699_vm4, %v693_v34  ;;  %v934_v39 = vpop.permute.xlu0 %933 }
  0x9f   : > { %v943_v40 = vsel %vm941_vm5, %v934_v39, %v942_v37 }
  0xa0   : > { %944 = vst [vmem:[#allocation2 + $0x14] sm:$0x7] %v943_v40 }
  0xa1   : > { %v932_v41 = vpop.permute.xlu1 %931 }
  0xa2   : > { %939 = vst.msk [vmem:[#allocation2 + $0xc] sm:$0xf] %vm668_vm10, %v932_v41  ;;  %v691_v31 = vpop.permute.xlu0 %690 }
  0xa3   : > { %700 = vst.msk [vmem:[#allocation2] sm:$0xf] %vm699_vm4, %v691_v31 }
  0xa5   : > { %v960_v45 = vpop.permute.xlu1 %959 }
  0xa6   : > { %v930_v32 = vpop.permute.xlu0 %929 }
  0xa7   : > { %938 = vst.msk [vmem:[#allocation2 + $0x4] sm:$0xf] %vm668_vm10, %v930_v32  ;;  %v965_v21 = vld [vmem:[#allocation2 + $0x14] sm:$0xc] }
  0xa8   : > { %v966_v42 = vsel %vm964_vm1, %v960_v45, %v965_v21 }
  0xa9   : > { %967 = vst [vmem:[#allocation2 + $0x14] sm:$0xc] %v966_v42 }
  0xaa   : > { %v664_v38 = vpop.permute.xlu0 %663  ;;  %v1494_v43 = vld [vmem:[#allocation2] ss:$8 sps:$4 sm:$0xff]  }
  0xab   : > { %676 = vst.msk [vmem:[#allocation2 + $0x10] sm:$0xf] %vm668_vm10, %v664_v38 }
  0xae   : > { %v695_v26 = vpop.permute.xlu0 %694  ;;  %v1496_v59 = vld [vmem:[#allocation2 + $0x4] ss:$8 sps:$4 sm:$0xff]  }
  0xaf   : > { %702 = vst.msk [vmem:[#allocation2 + $0x10] sm:$0xf] %vm699_vm4, %v695_v26  ;;  %1393 = vmatprep.mubr.msk.bf16.mxu0 %vm1105_vm14, %v1496_v59 }
  0xb0   : > { %1145 = vmatmul.mubr.bf16.vlgmr.msra.gmra.mrb[0].mxu0 %v1494_v43 }
  0xb6   : > { %v970_v46 = vld [vmem:[#allocation2 + $0x10] sm:$0xff] }
  0xb7   : > { %v1377_v47 = vcombine.low %v970_v46, %v970_v46  ;;  %v1378_v22 = vcombine.high %v970_v46, %v970_v46 }
  0xb9   : > { %1394 = vmatprep.mubr.msk.bf16.mxu1 %vm1105_vm14, %v1378_v22 }
  0xba   : > { %1153 = vmatmul.mubr.bf16.vlgmr.msra.gmra.mrb[0].mxu1 %v1377_v47 }
 0x183   : > { %v1146_v49 = vpop.f32.mrb[0].mxu0 }
 0x184   : > { %v1147_v24 = vadd.f32 %v1374_v48, %v1146_v49  ;;  %v1148_v27 = vpop.f32.mrb[1].mxu0 }
 0x185   : > { %v1149_v36 = vpop.f32.mrb[2].mxu0 }
 0x186   : > { %1161 = vst.msk [vmem:[%s462_s16] sm:$0xff] %vm1160_vm3, %v1147_v24  ;;  %v1150_v50 = vadd.f32 %v1374_v48, %v1149_v36  ;;  %v1151_v51 = vpop.f32.mrb[3].mxu0 }
 0x188   : > { %1162 = vst.msk [vmem:[%s462_s16 + $0x8] sm:$0xff] %vm1160_vm3, %v1150_v50 }
 0x18d   : > { %v1154_v52 = vpop.f32.mrb[0].mxu1 }
 0x18e   : > { %v1155_v53 = vadd.f32 %v1374_v48, %v1154_v52  ;;  %v1156_v54 = vpop.f32.mrb[1].mxu1 }
 0x18f   : > { %v1157_v55 = vpop.f32.mrb[2].mxu1 }
 0x190   : > { %1163 = vst.msk [vmem:[%s462_s16 + $0x10] sm:$0xff] %vm1160_vm3, %v1155_v53  ;;  %v1158_v56 = vpop.f32.mrb[3].mxu1 }
 0x191 PF: > { %s15_s20 = sadd.s32 1, %s1521_s20   ;;  %s1933_s18 = smov %s1517_s19 }
 0x192   : > { %p12_p5 = scmp.ge.s32.totalorder %s15_s20, 4   ;;  %s1934_s19 = smov %s1936_s2 }
 0x194   :  { %14 = sbr.rel (!%p12_p5) target bundleno = 2 (0x2), region = 82 }

</bundles_post_ra>
